<compile_context>
chip_gen: v7x
topology: tpu7x:2x2x1
jax: 0.10.0
libtpu: 0.0.40
codegen_flags: <defaults>
</compile_context>

<pallas_src>
import jax
import jax.numpy as jnp
from jax.experimental import pallas as pl
from jax.experimental.pallas import tpu as pltpu


# ----------------------------- kernel ----------------------------------------


def _make_kernel(hidden_dim, fuse_l2):
    """Kernel over one batch tile: x (tb, D) -> out (tb, 2) = [q1 | q2]."""
    f32 = jnp.float32
    H = hidden_dim

    def kernel(x_ref, wa_ref, ba_ref, w2p_ref, bb_ref, wh_ref, head_b_ref,
               out_ref):
        # ---- layer 1 (both branches fused): MXU dot in storage dtype, f32 acc.
        h = jnp.dot(x_ref[...], wa_ref[...], preferred_element_type=f32)
        h = jnp.sin(h + ba_ref[...].astype(f32))                  # (tb, 2H) f32

        # ---- layer 2: keep MXU operands in the weight's storage dtype
        # (bf16 x bf16 -> f32 accumulate on the native path; no f32 weight copy).
        w2_dtype = w2p_ref.dtype
        h_in = h if w2_dtype == jnp.float32 else h.astype(w2_dtype)
        if fuse_l2:
            # (tb, 2H) @ block-diag (2H, 2H) — one lane-dense dot for small H.
            h2 = jnp.dot(h_in, w2p_ref[...], preferred_element_type=f32)
        else:
            # Two (H, H) dots on the halves of the concatenated activation.
            h2 = jnp.concatenate(
                [jnp.dot(h_in[:, :H], w2p_ref[0], preferred_element_type=f32),
                 jnp.dot(h_in[:, H:], w2p_ref[1], preferred_element_type=f32)],
                axis=-1)
        h2 = h2 + bb_ref[...].astype(f32)
        # ELU (alpha=1).  Keep as a select: exp() may overflow for large +h but
        # the where() discards it — do NOT refactor into arithmetic masking.
        h2 = jnp.where(h2 > 0, h2, jnp.exp(h2) - 1.0)             # (tb, 2H) f32

        # ---- heads (N=1): VPU broadcast multiply + XLU lane reductions on the
        # two halves, biases read as SMEM scalars, one (tb, 2) store.
        ph = h2 * wh_ref[...].astype(f32)                         # (tb, 2H)
        q1 = jnp.sum(ph[:, :H], axis=-1, keepdims=True) + head_b_ref[0]
        q2 = jnp.sum(ph[:, H:], axis=-1, keepdims=True) + head_b_ref[1]
        out_ref[...] = jnp.concatenate([q1, q2], axis=-1).astype(out_ref.dtype)

    return kernel


# ----------------------------- tiling / wrapper -------------------------------


def _default_vmem_limit():
    """~75% of per-core VMEM (leaves headroom for Mosaic internal scratch)."""
    try:
        cap = pltpu.get_tpu_info().vmem_capacity_bytes
    except Exception:
        cap = 64 << 20            # worst case: v7x has 64 MiB per TensorCore
    return int(cap * 0.75)


def _choose_batch_tile(batch, feat_dim, hidden_dim, x_itemsize, w_itemsize,
                       budget_bytes, fuse_l2, single_buffer_weights,
                       max_rows=8192):
    """Largest sublane-aligned batch tile whose FULL working set (double-buffered
    x tile + resident packed weights + f32 activations + outputs) fits the VMEM
    budget.  Prefers even grid step counts (v7x core balance) and divisors of
    `batch` (no padded remainder)."""
    sub = 16 if x_itemsize == 2 else 8        # bf16 packs 2 rows / sublane
    two_h = 2 * hidden_dim

    # Resident packed weights (Wa, W2-pack, bias rows, head rows).
    w_elems = feat_dim * two_h + 3 * two_h
    w_elems += two_h * two_h if fuse_l2 else 2 * hidden_dim * hidden_dim
    w_bufs = 1 if single_buffer_weights else 2
    weight_bytes = w_bufs * w_elems * w_itemsize

    # Per-row bytes: double-buffered x row + double-buffered (.,2) f32 output
    # + ~3 f32 activation temporaries of width 2H (layer-1 / layer-2 / product).
    per_row = 2 * feat_dim * x_itemsize + 2 * 2 * 4 + 3 * two_h * 4
    avail = budget_bytes - weight_bytes
    rows = avail // per_row if avail > 0 else sub
    rows = int(max(sub, min(max_rows, rows)))
    rows -= rows % sub
    rows = max(rows, sub)

    if batch <= rows:
        # Small batch: split in two when cleanly possible so the "parallel"
        # grid axis has >=2 steps (one per v7x TensorCore).
        half = (batch // 2) - ((batch // 2) % sub)
        if half >= sub and batch % half == 0:
            return half
        return batch

    def steps(c):
        return -(-batch // c)

    # (a) divisor of batch with even step count, (b) any divisor,
    # (c) even step count, (d) plain budget-sized tile.
    lo_div = max(sub, (rows // 8) - (rows // 8) % sub)
    for pred, lo in (
            (lambda c: batch % c == 0 and steps(c) % 2 == 0, lo_div),
            (lambda c: batch % c == 0, lo_div),
            (lambda c: steps(c) % 2 == 0, max(sub, rows // 2)),
    ):
        for cand in range(rows, lo - 1, -sub):
            if pred(cand):
                return cand
    return rows


def pack_rff_critic_params(params):
    """Fuse the two branches' weights: Wa=(D,2H), W2-pack, (1,2H) bias/head rows,
    plus the two head biases as a (2,) f32 SMEM array."""
    H = params["w1"].shape[1]
    fuse_l2 = (2 * H) <= 128
    wa = jnp.concatenate([params["w1"], params["w4"]], axis=1)       # (D, 2H)
    ba = jnp.concatenate([params["b1"], params["b4"]], axis=1)       # (1, 2H)
    bb = jnp.concatenate([params["b2"], params["b5"]], axis=1)       # (1, 2H)
    wh = jnp.concatenate([params["w3"], params["w6"]], axis=1)       # (1, 2H)
    if fuse_l2:
        z2 = jnp.zeros_like(params["w2"])
        z5 = jnp.zeros_like(params["w5"])
        w2p = jnp.concatenate(
            [jnp.concatenate([params["w2"], z2], axis=1),
             jnp.concatenate([z5, params["w5"]], axis=1)], axis=0)   # (2H, 2H)
    else:
        w2p = jnp.stack([params["w2"], params["w5"]], axis=0)        # (2, H, H)
    head_bias = jnp.stack([params["b3"].reshape(()),
                           params["b6"].reshape(())]).astype(jnp.float32)
    return dict(wa=wa, ba=ba, w2p=w2p, bb=bb, wh=wh, head_bias=head_bias,
                hidden_dim=H, fuse_l2=fuse_l2)


def rff_critic_forward(feature, params, *, batch_tile=None,
                       vmem_limit_bytes=None, single_buffer_weights=False,
                       max_rows=8192):
    """feature: [B, D]; params: raw dict (init_rff_critic_params) or packed dict
    (pack_rff_critic_params).  Returns (q1, q2), each [B, 1] float32 — same
    semantics as RFFCritic.forward."""
    B, D = feature.shape
    packed = params if "wa" in params else pack_rff_critic_params(params)
    H = packed["hidden_dim"]
    fuse_l2 = packed["fuse_l2"]

    x_itemsize = jnp.dtype(feature.dtype).itemsize
    w_itemsize = jnp.dtype(packed["wa"].dtype).itemsize
    sub = 16 if x_itemsize == 2 else 8

    limit = (vmem_limit_bytes if vmem_limit_bytes is not None
             else _default_vmem_limit())
    tb = batch_tile if batch_tile is not None else _choose_batch_tile(
        B, D, H, x_itemsize, w_itemsize, int(limit * 0.7), fuse_l2,
        single_buffer_weights, max_rows=max_rows)
    if tb != B:
        tb = max(sub, tb - tb % sub)          # sublane-quantum alignment
    grid = pl.cdiv(B, tb)
    b_pad = grid * tb
    x = feature if b_pad == B else jnp.pad(feature, ((0, b_pad - B), (0, 0)))

    def wspec(shape):
        n = len(shape)
        idx = lambda i, _n=n: (0,) * _n
        if single_buffer_weights:
            # Constant-index blocks are fetched once; no prefetch buffer needed.
            return pl.BlockSpec(shape, idx, pipeline_mode=pl.Buffered(1))
        return pl.BlockSpec(shape, idx)

    w2p_shape = packed["w2p"].shape
    out = pl.pallas_call(
        _make_kernel(H, fuse_l2),
        out_shape=jax.ShapeDtypeStruct((b_pad, 2), jnp.float32),
        grid_spec=pltpu.PrefetchScalarGridSpec(
            num_scalar_prefetch=0,
            grid=(grid,),
            in_specs=[
                pl.BlockSpec((tb, D), lambda i: (i, 0)),             # x tile
                wspec((D, 2 * H)),                                   # Wa = [W1|W4]
                wspec((1, 2 * H)),                                   # ba = [b1|b4]
                wspec(w2p_shape),                                    # W2-pack
                wspec((1, 2 * H)),                                   # bb = [b2|b5]
                wspec((1, 2 * H)),                                   # Wh = [w3|w6]
                pl.BlockSpec(memory_space=pltpu.MemorySpace.SMEM),   # [b3, b6]
            ],
            out_specs=pl.BlockSpec((tb, 2), lambda i: (i, 0)),
        ),
        compiler_params=pltpu.CompilerParams(
            dimension_semantics=("parallel",),
            vmem_limit_bytes=int(limit)),
    )(x, packed["wa"], packed["ba"], packed["w2p"], packed["bb"], packed["wh"],
      packed["head_bias"])

    out = out[:B]
    return out[:, 0:1], out[:, 1:2]


# ----------------------------- params / reference -----------------------------


def init_rff_critic_params(key, feature_dim, hidden_dim):
    """PyTorch-style Linear init; W1/W2/W4/W5 stored [in, out], W3/W6 as (1, H)."""
    ks = jax.random.split(key, 12)

    def lin(kw, kb, fan_in, shape_w, shape_b):
        bound = 1.0 / (fan_in ** 0.5)
        w = jax.random.uniform(kw, shape_w, jnp.float32, -bound, bound)
        b = jax.random.uniform(kb, shape_b, jnp.float32, -bound, bound)
        return w, b

    w1, b1 = lin(ks[0], ks[1], feature_dim, (feature_dim, hidden_dim), (1, hidden_dim))
    w2, b2 = lin(ks[2], ks[3], hidden_dim, (hidden_dim, hidden_dim), (1, hidden_dim))
    w3, b3 = lin(ks[4], ks[5], hidden_dim, (1, hidden_dim), ())
    w4, b4 = lin(ks[6], ks[7], feature_dim, (feature_dim, hidden_dim), (1, hidden_dim))
    w5, b5 = lin(ks[8], ks[9], hidden_dim, (hidden_dim, hidden_dim), (1, hidden_dim))
    w6, b6 = lin(ks[10], ks[11], hidden_dim, (1, hidden_dim), ())
    return dict(w1=w1, b1=b1, w2=w2, b2=b2, w3=w3, b3=b3,
                w4=w4, b4=b4, w5=w5, b5=b5, w6=w6, b6=b6)


def cast_inputs_for_hbm(feature, params, dtype):
    """Cast HBM-resident tensors (feature + layer weights/biases) to `dtype`.
    The kernel feeds them to the MXU in that dtype (native bf16 path) and does
    all elementwise math / accumulation in f32; head biases stay f32 (SMEM)."""
    p = dict(params)
    for k in ("w1", "b1", "w2", "b2", "w3", "w4", "b4", "w5", "b5", "w6"):
        p[k] = params[k].astype(dtype)
    return feature.astype(dtype), p


def rff_critic_ref(feature, params):
    """Plain-JAX reference with the same math (f32, highest matmul precision)."""
    hi = jax.lax.Precision.HIGHEST
    mm = lambda a, b: jnp.dot(a, b, precision=hi)
    f = lambda a: a.astype(jnp.float32)
    elu = lambda v: jnp.where(v > 0, v, jnp.exp(v) - 1.0)
    x = f(feature)
    h1 = jnp.sin(mm(x, f(params["w1"])) + f(params["b1"]))
    h1 = elu(mm(h1, f(params["w2"])) + f(params["b2"]))
    q1 = mm(h1, f(params["w3"]).T) + params["b3"]
    h2 = jnp.sin(mm(x, f(params["w4"])) + f(params["b4"]))
    h2 = elu(mm(h2, f(params["w5"])) + f(params["b5"]))
    q2 = mm(h2, f(params["w6"]).T) + params["b6"]
    return q1, q2


# ----------------------------- demo -------------------------------------------

if __name__ == "__main__":
    # Small shapes consistent with the module: batch=16, feature_dim=32, hidden=32.
    # (batch=16 f32 exercises the multi-tile path: tb=8 -> 2 "parallel" steps.)
    B, D, H = 16, 32, 32
    key = jax.random.PRNGKey(0)
    k_x, k_p = jax.random.split(key)
    feature = jax.random.normal(k_x, (B, D), dtype=jnp.float32)
    params = init_rff_critic_params(k_p, D, H)

    # f32 HBM path.
    q1, q2 = jax.block_until_ready(rff_critic_forward(feature, params))
    r1, r2 = rff_critic_ref(feature, params)
    assert q1.shape == (B, 1) and q2.shape == (B, 1)
    assert jnp.allclose(q1, r1, atol=2e-2, rtol=2e-2)
    assert jnp.allclose(q2, r2, atol=2e-2, rtol=2e-2)

    # bf16 HBM-storage path: dot operands stay bf16 (native MXU path), all
    # elementwise math / accumulation is f32 inside the kernel.
    xb, pb = cast_inputs_for_hbm(feature, params, jnp.bfloat16)
    q1b, q2b = jax.block_until_ready(rff_critic_forward(xb, pb))
    r1b, r2b = rff_critic_ref(xb, pb)   # reference on the same bf16-rounded values
    assert jnp.allclose(q1b, r1b, atol=2e-2, rtol=2e-2)
    assert jnp.allclose(q2b, r2b, atol=2e-2, rtol=2e-2)

    # TODO(synk): RFFCritic.self.outputs (stateful dict of q1/q2) has no JAX
    # equivalent; the kernel just returns (q1, q2).
    print("KERNEL_OK")
</pallas_src>

<mosaic_0001>
module attributes {stable_mosaic.version = 11 : i64} {
  func.func @kernel(%arg0: i32, %arg1: memref<8x32xf32, #tpu.memory_space<vmem>>, %arg2: memref<32x64xf32, #tpu.memory_space<vmem>>, %arg3: memref<1x64xf32, #tpu.memory_space<vmem>>, %arg4: memref<64x64xf32, #tpu.memory_space<vmem>>, %arg5: memref<1x64xf32, #tpu.memory_space<vmem>>, %arg6: memref<1x64xf32, #tpu.memory_space<vmem>>, %arg7: memref<2xf32, #tpu.memory_space<smem>>, %arg8: memref<8x2xf32, #tpu.memory_space<vmem>>) attributes {dimension_semantics = [#tpu.dimension_semantics<parallel>], iteration_bounds = array<i64: 2>, scalar_prefetch = 0 : i64, scratch_operands = 0 : i64, tpu.core_type = #tpu.core_type<tc>, window_params = [{transform_indices = @transform_0, window_bounds = array<i64: 8, 32>}, {pipeline_mode = #tpu.pipeline_mode<synchronous>, transform_indices = @transform_1, window_bounds = array<i64: 32, 64>}, {pipeline_mode = #tpu.pipeline_mode<synchronous>, transform_indices = @transform_2, window_bounds = array<i64: 1, 64>}, {pipeline_mode = #tpu.pipeline_mode<synchronous>, transform_indices = @transform_3, window_bounds = array<i64: 64, 64>}, {pipeline_mode = #tpu.pipeline_mode<synchronous>, transform_indices = @transform_4, window_bounds = array<i64: 1, 64>}, {pipeline_mode = #tpu.pipeline_mode<synchronous>, transform_indices = @transform_5, window_bounds = array<i64: 1, 64>}, {transform_indices = @transform_6, window_bounds = array<i64: 2>}, {transform_indices = @transform_7, window_bounds = array<i64: 8, 2>}]} {
    %c0 = arith.constant 0 : index
    %c0_0 = arith.constant 0 : index
    %0 = vector.load %arg1[%c0, %c0_0] : memref<8x32xf32, #tpu.memory_space<vmem>>, vector<8x32xf32>
    %c0_1 = arith.constant 0 : index
    %c0_2 = arith.constant 0 : index
    %1 = vector.load %arg2[%c0_1, %c0_2] : memref<32x64xf32, #tpu.memory_space<vmem>>, vector<32x64xf32>
    %cst = arith.constant dense<0.000000e+00> : vector<8x64xf32>
    %2 = tpu.matmul %0, %1, %cst {dimension_numbers = #tpu.dot_dimension_numbers<[1], [0], [0], [1], [0, 0, 1, 1], [], []>} : vector<8x32xf32>, vector<32x64xf32>, vector<8x64xf32> -> vector<8x64xf32>
    %c0_3 = arith.constant 0 : index
    %c0_4 = arith.constant 0 : index
    %3 = vector.load %arg3[%c0_3, %c0_4] : memref<1x64xf32, #tpu.memory_space<vmem>>, vector<1x64xf32>
    %4 = vector.broadcast %3 : vector<1x64xf32> to vector<8x64xf32>
    %5 = arith.addf %2, %4 : vector<8x64xf32>
    %6 = math.sin %5 : vector<8x64xf32>
    %c0_5 = arith.constant 0 : index
    %c0_6 = arith.constant 0 : index
    %7 = vector.load %arg4[%c0_5, %c0_6] : memref<64x64xf32, #tpu.memory_space<vmem>>, vector<64x64xf32>
    %cst_7 = arith.constant dense<0.000000e+00> : vector<8x64xf32>
    %8 = tpu.matmul %6, %7, %cst_7 {dimension_numbers = #tpu.dot_dimension_numbers<[1], [0], [0], [1], [0, 0, 1, 1], [], []>} : vector<8x64xf32>, vector<64x64xf32>, vector<8x64xf32> -> vector<8x64xf32>
    %c0_8 = arith.constant 0 : index
    %c0_9 = arith.constant 0 : index
    %9 = vector.load %arg5[%c0_8, %c0_9] : memref<1x64xf32, #tpu.memory_space<vmem>>, vector<1x64xf32>
    %10 = vector.broadcast %9 : vector<1x64xf32> to vector<8x64xf32>
    %11 = arith.addf %8, %10 : vector<8x64xf32>
    %cst_10 = arith.constant 0.000000e+00 : f32
    %12 = vector.broadcast %cst_10 : f32 to vector<8x64xf32>
    %13 = arith.cmpf ogt, %11, %12 : vector<8x64xf32>
    %14 = math.exp %11 : vector<8x64xf32>
    %cst_11 = arith.constant 1.000000e+00 : f32
    %15 = vector.broadcast %cst_11 : f32 to vector<8x64xf32>
    %16 = arith.subf %14, %15 : vector<8x64xf32>
    %17 = arith.select %13, %11, %16 : vector<8x64xi1>, vector<8x64xf32>
    %c0_12 = arith.constant 0 : index
    %c0_13 = arith.constant 0 : index
    %18 = vector.load %arg6[%c0_12, %c0_13] : memref<1x64xf32, #tpu.memory_space<vmem>>, vector<1x64xf32>
    %19 = vector.broadcast %18 : vector<1x64xf32> to vector<8x64xf32>
    %20 = arith.mulf %17, %19 : vector<8x64xf32>
    %21 = vector.extract_strided_slice %20 {offsets = [0, 0], sizes = [8, 32], strides = [1, 1]} : vector<8x64xf32> to vector<8x32xf32>
    %cst_14 = arith.constant dense<0.000000e+00> : vector<8xf32>
    %22 = vector.multi_reduction <add>, %21, %cst_14 [1] : vector<8x32xf32> to vector<8xf32>
    %23 = vector.shape_cast %22 : vector<8xf32> to vector<8x1xf32>
    %c0_15 = arith.constant 0 : index
    %24 = memref.load %arg7[%c0_15] : memref<2xf32, #tpu.memory_space<smem>>
    %25 = vector.broadcast %24 : f32 to vector<8x1xf32>
    %26 = arith.addf %23, %25 : vector<8x1xf32>
    %27 = vector.extract_strided_slice %20 {offsets = [0, 32], sizes = [8, 32], strides = [1, 1]} : vector<8x64xf32> to vector<8x32xf32>
    %cst_16 = arith.constant dense<0.000000e+00> : vector<8xf32>
    %28 = vector.multi_reduction <add>, %27, %cst_16 [1] : vector<8x32xf32> to vector<8xf32>
    %29 = vector.shape_cast %28 : vector<8xf32> to vector<8x1xf32>
    %c1 = arith.constant 1 : index
    %30 = memref.load %arg7[%c1] : memref<2xf32, #tpu.memory_space<smem>>
    %31 = vector.broadcast %30 : f32 to vector<8x1xf32>
    %32 = arith.addf %29, %31 : vector<8x1xf32>
    %33 = tpu.concatenate %26, %32 in 1 : vector<8x1xf32>, vector<8x1xf32> -> vector<8x2xf32>
    %c0_17 = arith.constant 0 : index
    %c0_18 = arith.constant 0 : index
    %34 = vector.load %arg8[%c0_17, %c0_18] : memref<8x2xf32, #tpu.memory_space<vmem>>, vector<8x2xf32>
    tpu.vector_store %arg8[%c0_17, %c0_18], %33 {strides = array<i32>} : memref<8x2xf32, #tpu.memory_space<vmem>>, vector<8x2xf32>,
    return
  }
  func.func @transform_0(%arg0: i32) -> (i32, i32) {
    %c0_i32 = arith.constant 0 : i32
    %c0_i32_0 = arith.constant 0 : i32
    return %arg0, %c0_i32 : i32, i32
  }
  func.func @transform_1(%arg0: i32) -> (i32, i32) {
    %c0_i32 = arith.constant 0 : i32
    %c0_i32_0 = arith.constant 0 : i32
    %c0_i32_1 = arith.constant 0 : i32
    return %c0_i32, %c0_i32_0 : i32, i32
  }
  func.func @transform_2(%arg0: i32) -> (i32, i32) {
    %c0_i32 = arith.constant 0 : i32
    %c0_i32_0 = arith.constant 0 : i32
    %c0_i32_1 = arith.constant 0 : i32
    return %c0_i32, %c0_i32_0 : i32, i32
  }
  func.func @transform_3(%arg0: i32) -> (i32, i32) {
    %c0_i32 = arith.constant 0 : i32
    %c0_i32_0 = arith.constant 0 : i32
    %c0_i32_1 = arith.constant 0 : i32
    return %c0_i32, %c0_i32_0 : i32, i32
  }
  func.func @transform_4(%arg0: i32) -> (i32, i32) {
    %c0_i32 = arith.constant 0 : i32
    %c0_i32_0 = arith.constant 0 : i32
    %c0_i32_1 = arith.constant 0 : i32
    return %c0_i32, %c0_i32_0 : i32, i32
  }
  func.func @transform_5(%arg0: i32) -> (i32, i32) {
    %c0_i32 = arith.constant 0 : i32
    %c0_i32_0 = arith.constant 0 : i32
    %c0_i32_1 = arith.constant 0 : i32
    return %c0_i32, %c0_i32_0 : i32, i32
  }
  func.func @transform_6(%arg0: i32) -> i32 {
    %c0_i32 = arith.constant 0 : i32
    %c0_i32_0 = arith.constant 0 : i32
    return %c0_i32 : i32
  }
  func.func @transform_7(%arg0: i32) -> (i32, i32) {
    %c0_i32 = arith.constant 0 : i32
    %c0_i32_0 = arith.constant 0 : i32
    return %arg0, %c0_i32 : i32, i32
  }
}

</mosaic_0001>

<bundles_post_ra>
// kernel: tpu_custom_call.1
= control target key start
LH: loop header
LB: loop body
LE: loop exit
PB: predicated region body
PF: predicated region fallthrough
CT: control target
= control target key end

     0   :  { %12 = vsyncpa [#allocation3], 0  ;;  %s1357_s0 = inlined_call_operand.hbm [shape: f32[16,32], index: 0, kind: input, shape index: {}]   ;;  %s1358_s1 = inlined_call_operand.hbm [shape: f32[32,64], index: 1, kind: input, shape index: {}]   ;;  %s1359_s2 = inlined_call_operand.vmem [shape: f32[1,64], index: 2, kind: input, shape index: {}]   ;;  %s1360_s3 = inlined_call_operand.hbm [shape: f32[64,64], index: 3, kind: input, shape index: {}]   ;;  %s1361_s4 = inlined_call_operand.vmem [shape: f32[1,64], index: 4, kind: input, shape index: {}]   ;;  %s1362_s5 = inlined_call_operand.vmem [shape: f32[1,64], index: 5, kind: input, shape index: {}]   ;;  %s1363_s6 = inlined_call_operand.vmem [shape: f32[2], index: 6, kind: input, shape index: {}]   ;;  %s1364_s7 = inlined_call_operand.vmem [shape: f32[16,2], index: 7, kind: output, shape index: {}]  }
   0x1   :  { %14 = vsyncpa [#allocation3 + $0x1], 0 }
   0x2   :  { %15 = vsyncpa [#allocation6], 0 }
   0x3   :  { %16 = vsyncpa [#allocation4], 0  ;;  %s1127_s24 = smov 0   ;;  %s1129_s25 = smov 0  }
   0x4   :  { %s1131_s26 = smov 0   ;;  %s1133_s27 = smov 0  }
   0x5 LB: > { %s1146_s28 = sadd.s32 4294967295, %s1069_s27   ;;  %p42_p0 = scmp.ne.s32.totalorder %s1061_s25, %s1057_s24  ;;  %s1069_s27 = sphi %s1133_s27, %s1380_s27   ;;  %s1065_s26 = sphi %s1131_s26, %s1379_s26   ;;  %s1061_s25 = sphi %s1129_s25, %s1378_s25   ;;  %s1057_s24 = sphi %s1127_s24, %s1377_s24  }
   0x6   : > { %p1365_p1 = scmp.eq.s32.totalorder %s1146_s28, 0  ;;  %p746_p2 = scmp.ge.s32.totalorder %s1069_s27, 1 }
   0x7   : > { %p205_p3 = scmp.lt.s32.totalorder %s1069_s27, 3  ;;  %s1071_s8 = smov [#allocation5]  }
   0x8   : > { %p1154_p4 = por %p1365_p1, %p42_p0  ;;  %s217_s9 = sshll.u32 %s1071_s8, 4  ;;  %s1162_s9 = int_to_ptr.vmem [resolvable:$true] %s217_s9 }
   0x9   : > { %p1158_p5 = pnand %p746_p2, %p205_p3  ;;  %s1072_s11 = smov [#allocation7]  }
   0xa   : > { %s1367_s29 = scalar_select %p1154_p4, 1, 0 }
   0xb   : > { %p852_p6 = pneg %p1158_p5  ;;  %s233_s12 = sshll.u32 %s1072_s11, 4  ;;  %s1172_s12 = int_to_ptr.vmem [resolvable:$true] %s233_s12 }
   0xc   : > { %s253_s15 = sshll.u32 %s1363_s6, 4  ;;  %s926_s18 = scalar_lea.hbm %s1358_s1, 512  ;;  %s1177_s15 = int_to_ptr.vmem [resolvable:$true] %s253_s15 }
   0xd   : > { %p1168_p7 = pnand %p852_p6, %p1365_p1  ;;  %p927_p8 = scmp.ne.s32.totalorder %s1358_s1, %s926_s18 }
   0xe   : > { %p933_p12 = scmp.lt.u32.totalorder %s926_s18, %s1358_s1 }
   0xf   : > { %p1187_p9 = pneg %p1168_p7 }
  0x11   : > { %p929_p10 = pnand %p1187_p9, %p927_p8 }
  0x13   : > { %p930_p11 = pneg %p929_p10 }
  0x15   : > { %p935_p13 = pnand %p933_p12, %p930_p11 }
  0x17   : > { %938 = shalt.err (!%p935_p13)
}
  0x18   : > { %s939_s24 = scalar_lea.vmem %s1162_s9, 512  ;;  %p947_p6 = scmp.lt.s32.totalorder %s1162_s9, %s1162_s9 }
  0x19   : > { %p940_p0 = scmp.ne.s32.totalorder %s1162_s9, %s939_s24  ;;  %p948_p1 = scmp.lt.s32.totalorder %s939_s24, %s939_s24 }
  0x1b   : > { %p942_p2 = pnand %p940_p0, %p1187_p9  ;;  %p949_p8 = por %p948_p1, %p947_p6 }
  0x1d   : > { %p943_p3 = pneg %p942_p2 }
  0x1f   : > { %p950_p10 = pnand %p949_p8, %p943_p3 }
  0x21   : > { %953 = shalt.err (!%p950_p10)
}
  0x22   : > { %s1073_s8 = smov 128   ;;  %s1074_s11 = smov 8  }
  0x23   : > { %855 = dma.hbm_to_vmem [thread:$0]  (!%p1168_p7), %s1358_s1, 512, %s1162_s9, [#allocation6], %s1073_s8, %s1073_s8, %s1074_s11  }
  0x24   : > { %s954_s18 = scalar_lea.hbm %s1360_s3, 1024 }
  0x25   : > { %p955_p1 = scmp.ne.s32.totalorder %s1360_s3, %s954_s18  ;;  %p961_p13 = scmp.lt.u32.totalorder %s954_s18, %s1360_s3 }
  0x27   : > { %p957_p11 = pnand %p955_p1, %p1187_p9 }
  0x29   : > { %p958_p12 = pneg %p957_p11 }
  0x2b   : > { %p963_p0 = pnand %p961_p13, %p958_p12 }
  0x2d   : > { %966 = shalt.err (!%p963_p0)
}
  0x2e   : > { %s967_s9 = scalar_lea.vmem %s1172_s12, 1024  ;;  %p975_p8 = scmp.lt.s32.totalorder %s1172_s12, %s1172_s12 }
  0x2f   : > { %p968_p2 = scmp.ne.s32.totalorder %s1172_s12, %s967_s9  ;;  %p976_p10 = scmp.lt.s32.totalorder %s967_s9, %s967_s9 }
  0x31   : > { %p970_p3 = pnand %p968_p2, %p1187_p9  ;;  %p977_p1 = por %p976_p10, %p975_p8 }
  0x33   : > { %p971_p6 = pneg %p970_p3 }
  0x35   : > { %p978_p11 = pnand %p977_p1, %p971_p6 }
  0x37   : > { %981 = shalt.err (!%p978_p11)
}
  0x38   : > { %858 = dma.hbm_to_vmem [thread:$0]  (!%p1168_p7), %s1360_s3, 1024, %s1172_s12, [#allocation6], %s1073_s8, %s1073_s8, %s1074_s11  }
  0x39   : > { %s982_s14 = scalar_lea.vmem %s1177_s15, 16  ;;  %p990_p2 = scmp.lt.s32.totalorder %s1177_s15, %s1177_s15 }
  0x3a   : > { %p983_p12 = scmp.ne.s32.totalorder %s1177_s15, %s982_s14  ;;  %p991_p3 = scmp.lt.s32.totalorder %s982_s14, %s982_s14 }
  0x3c   : > { %p985_p13 = pnand %p983_p12, %p1187_p9  ;;  %p992_p6 = por %p991_p3, %p990_p2 }
  0x3e   : > { %p986_p0 = pneg %p985_p13 }
  0x40   : > { %p993_p8 = pnand %p992_p6, %p986_p0 }
  0x42   : > { %996 = shalt.err (!%p993_p8)
}
  0x43   : > { %s1075_s16 = smov [#allocation8]   ;;  %s1241_s12 = sadd.s32 1, %s1069_s27  }
  0x44   : > { %861 = dma.vmem_to_smem (!%p1168_p7), %s1177_s15, 16, %s1075_s16, [#allocation4]  }
  0x45   : > { %s26_s21 = ssub.s32 %s1069_s27, %s1241_s12  ;;  %s29_s8 = sadd.s32 1, %s1065_s26 }
  0x46   : > { %p27_p9 = scmp.eq.s32.totalorder %s26_s21, 0  ;;  %p36_p10 = scmp.ne.s32.totalorder %s1065_s26, %s1061_s25 }
  0x47   : > { %p37_p1 = scmp.eq.s32.totalorder %s1069_s27, 0  ;;  %p869_p11 = scmp.lt.s32.totalorder %s1069_s27, 2 }
  0x48   : > { %s1251_s10 = scalar_select %p27_p9, %s1065_s26, %s29_s8  }
  0x49   : > { %p38_p12 = por %p37_p1, %p36_p10  ;;  %s264_s11 = sand.u32 1, %s1065_s26  }
  0x4a   : > { %s751_s17 = sshll.u32 %s264_s11, 3  ;;  %s752_s18 = sshll.u32 %s1069_s27, 7 }
  0x4b   : > { %s1258_s22 = scalar_lea.hbm %s1357_s0, %s752_s18  ;;  %s268_s15 = scalar_lea.vmem [#allocation2], %s751_s17 }
  0x4c   : > { %s275_s23 = sshll.u32 %s268_s15, 4  ;;  %p1262_p7 = pnand %p869_p11, %p38_p12  ;;  %s1260_s23 = int_to_ptr.vmem [resolvable:$true] %s275_s23 }
  0x4d   : > { %s265_s27 = scalar_lea.sflag [#allocation3], %s264_s11  ;;  %s997_s24 = scalar_lea.hbm %s1258_s22, 128 }
  0x4e   : > { %p998_p13 = scmp.ne.s32.totalorder %s1258_s22, %s997_s24  ;;  %p999_p0 = pneg %p1262_p7 }
  0x4f   : > { %s1002_s16 = scalar_lea.hbm %s1357_s0, 256  ;;  %p1003_p6 = scmp.lt.u32.totalorder %s1258_s22, %s1357_s0 }
  0x50   : > { %p1000_p2 = pnand %p999_p0, %p998_p13  ;;  %p1004_p8 = scmp.lt.u32.totalorder %s1002_s16, %s997_s24 }
  0x51   : > { %p1006_p10 = scmp.lt.u32.totalorder %s997_s24, %s1258_s22 }
  0x52   : > { %p1001_p3 = pneg %p1000_p2  ;;  %p1005_p9 = por %p1004_p8, %p1003_p6 }
  0x54   : > { %p1007_p1 = por %p1006_p10, %p1005_p9 }
  0x56   : > { %p1008_p11 = pnand %p1007_p1, %p1001_p3 }
  0x58   : > { %1011 = shalt.err (!%p1008_p11)
}
  0x59   : > { %s1012_s11 = scalar_lea.vmem %s1260_s23, 128  ;;  %s1076_s17 = smov [#allocation2]  }
  0x5a   : > { %p1013_p12 = scmp.ne.s32.totalorder %s1260_s23, %s1012_s11  ;;  %s1017_s18 = sshll.u32 %s1076_s17, 4  ;;  %s1018_s18 = int_to_ptr.vmem [resolvable:$false] %s1017_s18 }
  0x5b   : > { %s1019_s19 = scalar_lea.vmem %s1018_s18, 256  ;;  %p1020_p4 = scmp.lt.s32.totalorder %s1260_s23, %s1018_s18 }
  0x5c   : > { %p1015_p13 = pnand %p1013_p12, %p999_p0  ;;  %p1021_p6 = scmp.lt.s32.totalorder %s1019_s19, %s1012_s11 }
  0x5e   : > { %p1016_p2 = pneg %p1015_p13  ;;  %p1022_p8 = por %p1021_p6, %p1020_p4 }
  0x60   : > { %p1023_p9 = pnand %p1022_p8, %p1016_p2 }
  0x62   : > { %1026 = shalt.err (!%p1023_p9)
}
  0x63   : > { %865 = dma.hbm_to_vmem [thread:$0]  (!%p1262_p7), %s1258_s22, 128, %s1260_s23, %s265_s27  }
  0x64   : > { %284 = sbr.rel (%p1158_p5) target bundleno = 914 (0x392), region = 48  ;;  %s286_s20 = sand.u32 (!%p1158_p5), 1, %s1061_s25  }
  0x65   : > { %s754_s15 = sshll.u32 (!%p1158_p5), %s286_s20, 3  ;;  %s287_s24 = scalar_lea.sflag (!%p1158_p5), [#allocation3], %s286_s20 }
  0x66   : > { %s290_s13 = scalar_lea.vmem (!%p1158_p5), [#allocation2], %s754_s15  ;;  %p1372_p0 = scmp.ne.s32.totalorder (!%p1158_p5), %s1367_s29, 0 }
  0x6b   : > { %1044 = dma.done.wait (%p1372_p0), %s287_s24, 128  }
  0x6c   : > { %1046 = vsyncadd (%p1372_p0), %s287_s24, 4294967168  ;;  %p1373_p4 = scmp.eq.s32.totalorder %s1146_s28, 0 }
  0x6e   : > { %1048 = dma.done.wait (%p1373_p4), [#allocation6], 1536   ;;  %p1374_p3 = pmov %p1373_p4 }
  0x70   : > { %1050 = vsyncadd (%p1374_p3), [#allocation6], 4294965760  ;;  %p1375_p7 = pmov %p1374_p3 }
  0x71   : > { %p1376_p5 = pmov %p1374_p3 }
  0x72   : > { %1052 = dma.done.wait (%p1375_p7), [#allocation4], 16  }
  0x73   : > { %1054 = vsyncadd (%p1376_p5), [#allocation4], 4294967280 }
  0x74   : > { %307 = sfence }
  0x75   : > { %v338_v0 = vld [vmem:[#allocation5] sm:$0xff]  ;;  %v339_v1 = vld [vmem:[#allocation5 + $0x8] sm:$0xff]  ;;  %v340_v2 = vld [vmem:[#allocation5 + $0x10] sm:$0xff]  ;;  %v1077_v3 = vmov 0.0|0.0   ;;  %vm1078_vm0 = vmmov 0   ;;  %v1079_v6 = vmov 0.0  }
  0x76   : > { %816 = vmatprep.subr.bf16.mxu0 %v1077_v3  ;;  %v817_v4 = vpack.c.bf16 %v339_v1, %v338_v0  ;;  %v341_v5 = vld [vmem:[#allocation5 + $0x18] sm:$0xff]  ;;  %794 = vmatprep.mubr.msk.f32.mxu0 %vm1078_vm0, %v1079_v6  ;;  %vm349_vm1 = vcmask 261120   ;;  %v527_v9 = vld [vmem:[#allocation7] sm:$0xff]  ;;  %v528_v10 = vld [vmem:[#allocation7 + $0x8] sm:$0xff]  ;;  %v1080_v35 = vmov 683565275  }
  0x77   : > { %822 = vmatprep.subr.bf16.mxu1 %v1077_v3  ;;  %813 = vmatprep.mubr.msk.f32.mxu1 %vm1078_vm0, %v1079_v6  ;;  %v820_v7 = vpack.c.bf16 %v341_v5, %v340_v2  ;;  %v337_v8 = vld [vmem:[%s290_s13] sm:$0xff]  ;;  %v823_v11 = vpack.c.bf16 %v528_v10, %v527_v9  ;;  %v531_v15 = vld [vmem:[#allocation7 + $0x20] sm:$0xff]  ;;  %v532_v16 = vld [vmem:[#allocation7 + $0x28] sm:$0xff]  ;;  %v1081_v37 = vmov 2475754826   ;;  %vm542_vm14 = vcmask 523264  }
  0x78   : > { %818 = vmatpush3.bf16.msra.mxu0 %v817_v4  ;;  %v529_v12 = vld [vmem:[#allocation7 + $0x10] sm:$0xff]  ;;  %v530_v13 = vld [vmem:[#allocation7 + $0x18] sm:$0xff]  ;;  %v829_v17 = vpack.c.bf16 %v532_v16, %v531_v15  ;;  %v1082_v40 = vmov 2131351028   ;;  %v1083_v43 = vmov 2102212464  }
  0x79   : > { %819 = vmatprep.subr.bf16.mxu0 %v1077_v3  ;;  %824 = vmatpush3.bf16.msra.mxu1 %v823_v11  ;;  %v826_v14 = vpack.c.bf16 %v530_v13, %v529_v12  ;;  %v533_v18 = vld [vmem:[#allocation7 + $0x30] sm:$0xff]  ;;  %v534_v19 = vld [vmem:[#allocation7 + $0x38] sm:$0xff]  ;;  %v1084_v46 = vmov 920167782   ;;  %v1085_v49 = vmov 1326507024  }
  0x7a   : > { %825 = vmatprep.subr.bf16.mxu1 %v1077_v3  ;;  %v832_v20 = vpack.c.bf16 %v534_v19, %v533_v18  ;;  %v759_v21 = vld [vmem:[%s1359_s2] ss:$0 sm:$0xff]  ;;  %s1086_s14 = smov 96   ;;  %s632_s16 = sld [smem:[#allocation8]] }
  0x7b   : > { %s769_s21 = sld [smem:[#allocation8 + $0x1]]  ;;  %p333_p10 = scmp.lt.s32.totalorder %s1146_s28, 1 }
  0x7c   : > { %821 = vmatpush3.bf16.msra.mxu0 %v820_v7 }
  0x7d   : > { %827 = vmatpush3.bf16.msra.mxu1 %v826_v14  ;;  %s1382_s28 = smov (!%p333_p10, %s1146_s28), 1 }
  0x7e   : > { %828 = vmatprep.subr.bf16.mxu1 %v1077_v3  ;;  %s758_s8 = sshll.u32 %s1382_s28, 3 }
  0x7f   : > { %795 = vmatmul.mubr.msk.f32.vlgmr.msra.gmra.mrb[0].mxu0 %vm349_vm1, %v337_v8  ;;  %s336_s18 = scalar_lea.vmem %s1364_s7, %s758_s8 }
  0x81   : > { %830 = vmatpush3.bf16.msra.mxu1 %v829_v17 }
  0x82   : > { %831 = vmatprep.subr.bf16.mxu1 %v1077_v3 }
  0x85   : > { %833 = vmatpush3.bf16.msra.mxu1 %v832_v20 }
 0x152   : > { %v419_v22 = vpop.f32.mrb[0].mxu0 }
 0x153   : > { %v1310_v23 = vadd.f32 %v759_v21, %v419_v22  ;;  %v796_v24 = vpop.f32.mrb[1].mxu0 }
 0x155   : > { %v426_v25 = vand.u32 2139095040, %v1310_v23  ;;  %v423_v29 = vand.u32 2147483647, %v1310_v23  ;;  %vm425_vm9 = vcmp.lt.s32.totalorder %v1310_v23, 0  ;;  %vm515_vm15 = vweird.f32 %v1310_v23 }
 0x157   : > { %v427_v26 = vshrl.u32 %v426_v25, 23  ;;  %v430_v32 = vand.u32 8388607, %v423_v29  ;;  %vm424_vm10 = vcmp.le.f32.partialorder %v423_v29, 0.7853982 }
 0x159   : > { %v761_v27 = vadd.s32 4294967169, %v427_v26  ;;  %v431_v51 = vor.u32 8388608, %v430_v32 }
 0x15b   : > { %v433_v28 = vadd.s32 1, %v761_v27  ;;  %v471_v1 = vshll.u32 %v431_v51, 8 }
 0x15d   : > { %vm434_vm2 = vcmp.gt.s32.totalorder %v433_v28, 0 }
 0x15e   : > { %v435_v30 = vsel %vm434_vm2, %v433_v28, 0  ;;  %vm645_vm2 = vcmask 7168  }
 0x15f   : > { %v437_v31 = vand.u32 31, %v435_v30  ;;  %v436_v34 = vshrl.u32 %v435_v30, 5 }
 0x161   : > { %v438_v33 = vsub.s32 32, %v437_v31  ;;  %v440_v36 = vshll.u32 %v1080_v35, %v437_v31  ;;  %v443_v38 = vshll.u32 %v1081_v37, %v437_v31  ;;  %v446_v42 = vshll.u32 %v1082_v40, %v437_v31 }
 0x162   : > { %v449_v45 = vshll.u32 %v1083_v43, %v437_v31  ;;  %v452_v48 = vshll.u32 %v1084_v46, %v437_v31  ;;  %vm455_vm3 = vcmp.lt.s32.totalorder %v436_v34, 1  ;;  %vm458_vm4 = vcmp.lt.s32.totalorder %v436_v34, 4 }
 0x163   : > { %v441_v39 = vshrl.u32 %v1081_v37, %v438_v33  ;;  %v444_v41 = vshrl.u32 %v1082_v40, %v438_v33  ;;  %v447_v44 = vshrl.u32 %v1083_v43, %v438_v33  ;;  %v450_v47 = vshrl.u32 %v1084_v46, %v438_v33 }
 0x164   : > { %v453_v50 = vshrl.u32 %v1085_v49, %v438_v33  ;;  %v439_v60 = vshrl.u32 %v1080_v35, %v438_v33  ;;  %vm457_vm5 = vcmp.lt.s32.totalorder %v436_v34, 3  ;;  %vm456_vm6 = vcmp.lt.s32.totalorder %v436_v34, 2 }
 0x165   : > { %v442_v52 = vor.u32 %v441_v39, %v440_v36  ;;  %v445_v53 = vor.u32 %v444_v41, %v443_v38  ;;  %v448_v54 = vor.u32 %v447_v44, %v446_v42  ;;  %v451_v55 = vor.u32 %v450_v47, %v449_v45 }
 0x166   : > { %v454_v56 = vor.u32 %v453_v50, %v452_v48 }
 0x167   : > { %v460_v57 = vsel %vm458_vm4, %v448_v54, 2102212464  ;;  %v463_v58 = vsel %vm455_vm3, %v442_v52, %v445_v53  ;;  %v467_v59 = vsel %vm455_vm3, %v445_v53, %v448_v54  ;;  %v464_v61 = vsel %vm458_vm4, %v451_v55, 920167782 }
 0x168   : > { %v468_v62 = vsel %vm458_vm4, %v454_v56, 1326507024  ;;  %v465_v63 = vsel %vm457_vm5, %v448_v54, %v464_v61  ;;  %v459_v2 = vsel %vm455_vm3, %v439_v60, %v442_v52  ;;  %v461_v3 = vsel %vm457_vm5, %v445_v53, %v460_v57  ;;  %v765_v53 = vld [vmem:[%s1361_s4] ss:$0 sm:$0xff] }
 0x169   : > { %v469_v0 = vsel %vm457_vm5, %v451_v55, %v468_v62  ;;  %v466_v4 = vsel %vm456_vm6, %v463_v58, %v465_v63  ;;  %v462_v10 = vsel %vm456_vm6, %v459_v2, %v461_v3  ;;  %v643_v3 = vstv %s769_s21 }
 0x16a   : > { %v470_v5 = vsel %vm456_vm6, %v467_v59, %v469_v0  ;;  %v1319_v8 = vmul.u32.u64.low %v471_v1, %v466_v4  ;;  %v1320_v9 = vmul.u32.u64.high %v471_v1, %v466_v4, %v1319_v8  ;;  %v478_v12 = vmul.u32 %v471_v1, %v462_v10 }
 0x16b   : > { %v1316_v6 = vmul.u32.u64.low %v471_v1, %v470_v5  ;;  %v1317_v7 = vmul.u32.u64.high %v471_v1, %v470_v5, %v1316_v6  ;;  %v633_v1 = vstv %s632_s16  ;;  %vm647_vm3 = vcmask 15360  }
 0x16c   : > { %v481_v11 = vadd.s32 1, %v1320_v9 }
 0x16d   : > { %vm480_vm7 = vc.u32 %v1317_v7, %v1319_v8  ;;  %v479_v25 = vadd.s32 %v1319_v8, %v1317_v7 }
 0x16e   : > { %v482_v13 = vsel %vm480_vm7, %v481_v11, %v1320_v9 }
 0x16f   : > { %v483_v14 = vadd.s32 %v482_v13, %v478_v12 }
 0x171   : > { %v484_v15 = vadd.s32 536870912, %v483_v14 }
 0x173   : > { %v485_v16 = vshrl.u32 %v484_v15, 30 }
 0x175   : > { %v486_v17 = vshll.u32 %v485_v16, 30  ;;  %v509_v38 = vsub.s32 4, %v485_v16 }
 0x177   : > { %v487_v18 = vsub.s32 %v483_v14, %v486_v17  ;;  %v510_v41 = vsel %vm425_vm9, %v509_v38, %v485_v16 }
 0x178   : > { %v512_v43 = vsel %vm424_vm10, 0, %v510_v41 }
 0x179   : > { %v489_v19 = vsub.s32 0, %v487_v18  ;;  %v516_v44 = vadd.s32 3, %v512_v43 }
 0x17b   : > { %v762_v20 = vmin.u32 %v489_v19, %v487_v18  ;;  %v517_v45 = vand.u32 3, %v516_v44 }
 0x17d   : > { %v491_v21 = vclz %v762_v20  ;;  %vm522_vm11 = vcmp.eq.s32.totalorder %v517_v45, 2  ;;  %vm519_vm12 = vcmp.eq.s32.totalorder %v517_v45, 0  ;;  %vm518_vm13 = vcmp.lt.s32.totalorder %v517_v45, 2 }
 0x17f   : > { %v763_v22 = vadd.s32 4294967294, %v491_v21 }
 0x181   : > { %vm764_vm8 = vcmp.lt.s32.totalorder %v763_v22, 0 }
 0x182   : > { %v494_v24 = vsel %vm764_vm8, 0, %v763_v22 }
 0x183   : > { %v495_v26 = vsub.s32 32, %v494_v24  ;;  %v499_v27 = vsub.s32 4294967266, %v494_v24  ;;  %v496_v28 = vshll.u32 %v487_v18, %v494_v24 }
 0x185   : > { %v497_v30 = vshrl.u32 %v479_v25, %v495_v26  ;;  %v500_v31 = vadd.s32 127, %v499_v27 }
 0x187   : > { %v498_v32 = vor.u32 %v497_v30, %v496_v28  ;;  %v501_v33 = vshll.u32 %v500_v31, 23 }
 0x189   : > { %v502_v34 = vor.u32 4788187, %v501_v33  ;;  %v505_v36 = vcvt.s32.f32 %v498_v32 }
 0x18b   : > { %v503_v35 = vand.u32 2147483647, %v502_v34 }
 0x18d   : > { %v506_v37 = vmul.f32 %v505_v36, %v503_v35 }
 0x18f   : > { %v507_v39 = vxor.u32 2147483648, %v506_v37 }
 0x191   : > { %v508_v40 = vsel %vm425_vm9, %v507_v39, %v506_v37 }
 0x192   : > { %v511_v42 = vsel %vm424_vm10, %v1310_v23, %v508_v40  ;;  %v768_v23 = vld [vmem:[%s1362_s5] ss:$0 sm:$0xff] }
 0x193   : > { %920 = vcosq.f32 %v511_v42 }
 0x194   : > { %922 = vsinq.f32 %v511_v42 }
 0x19d   : > { %v921_v46 = vpop.eup %920 }
 0x19e   : > { %v923_v47 = vpop.eup %922  ;;  %v523_v48 = vxor.u32 2147483648, %v921_v46 }
 0x19f   : > { %v520_v49 = vxor.u32 2147483648, %v923_v47 }
 0x1a0   : > { %v524_v50 = vsel %vm522_vm11, %v523_v48, %v923_v47 }
 0x1a1   : > { %v521_v51 = vsel %vm519_vm12, %v921_v46, %v520_v49 }
 0x1a2   : > { %v525_v29 = vsel %vm518_vm13, %v521_v51, %v524_v50 }
 0x1a3   : > { %v526_v52 = vsel %vm515_vm15, nan, %v525_v29 }
 0x1a4   : > { %814 = vmatmul.mubr.msk.f32.vlgmr.msra.gmra.mrb[0].mxu1 %vm542_vm14, %v526_v52 }
 0x277   : > { %v612_v54 = vpop.f32.mrb[0].mxu1 }
 0x278   : > { %v613_v55 = vadd.f32 %v765_v53, %v612_v54  ;;  %v815_v56 = vpop.f32.mrb[1].mxu1 }
 0x27a   : > { %v617_v57 = vmul.f32 1.442695, %v613_v55  ;;  %vm616_vm0 = vcmp.gt.f32.partialorder %v613_v55, 0.0 }
 0x27c   : > { %924 = vpow2.f32 %v617_v57 }
 0x286   : > { %v925_v58 = vpop.eup %924 }
 0x287   : > { %v767_v59 = vadd.f32 -1.0, %v925_v58 }
 0x289   : > { %v620_v60 = vsel %vm616_vm0, %v613_v55, %v767_v59 }
 0x28a   : > { %v628_v61 = vmul.f32 %v768_v23, %v620_v60 }
 0x28c   : > { %636 = vrot.lane.b32.xlu0 %v628_v61, %s1086_s14  ;;  %v629_v62 = vsel %vm349_vm1, %v628_v61, 0.0 }
 0x2ab   : > { %630 = vadd.xlane.f32.xlu0 %v629_v62 }
 0x2fe   : > { %v637_v63 = vpop.permute.xlu0 %636 }
 0x2ff   : > { %v639_v0 = vsel %vm349_vm1, %v637_v63, 0.0 }
 0x300   : > { %640 = vadd.xlane.f32.xlu1 %v639_v0 }
 0x338   : > { %v631_v2 = vpop.xlane.xlu0 %630 }
 0x339   : > { %v634_v5 = vadd.f32 %v633_v1, %v631_v2 }
 0x38d   : > { %v641_v4 = vpop.xlane.xlu1 %640 }
 0x38e   : > { %v644_v6 = vadd.f32 %v643_v3, %v641_v4 }
 0x390   : > { %v646_v7 = vsel %vm645_vm2, %v634_v5, %v644_v6 }
 0x391   : > { %648 = vst.msk [vmem:[%s336_s18] sm:$0xff] %vm647_vm3, %v646_v7 }
 0x392 PF: > { %p19_p1 = scmp.ge.s32.totalorder %s1241_s12, 4   ;;  %s1377_s24 = smov %s1061_s25 }
 0x393   : > { %s1378_s25 = smov %s1065_s26  ;;  %s1379_s26 = smov %s1251_s10 }
 0x394   : > { %s1380_s27 = smov %s1241_s12  ;;  %21 = sbr.rel (!%p19_p1) target bundleno = 5 (0x5), region = 101 }
 0x39b   :  { %668 = vsyncpa [#allocation3], 1 }
 0x39c   :  { %670 = vsyncpa [#allocation3 + $0x1], 1 }
 0x39d   :  { %671 = vsyncpa [#allocation6], 1 }
 0x39e   :  { %672 = vsyncpa [#allocation4], 1 }
 0x39f   :  { %674 = vsyncpa [#allocation4 + $0x1], 1 }

</bundles_post_ra>
